<compile_context>
chip_gen: v7x
topology: tpu7x:2x2x1
jax: 0.10.0
libtpu: 0.0.40
codegen_flags: <defaults>
</compile_context>

<pallas_src>
import jax
import jax.numpy as jnp
from jax.experimental import pallas as pl
from jax.experimental.pallas import tpu as pltpu


_BATCH_TILE = 8     # sublane-aligned batch tile
_HID = 64           # logical hidden width  (nn.Linear(2E+1, 64))
_HID_PAD = 128      # lane-dense padded hidden width (zero-padded weights)


# ----------------------------------------------------------------------------
# Fused kernel: whole forward pass for one batch tile.
# ----------------------------------------------------------------------------
def _embed_cmp_kernel(ea_ref, ta_ref, eb_ref, tb_ref,
                      w1a_ref, w1t_ref, w1b_ref, b1_ref,
                      w2_ref, b2_ref, o_ref):
    ea = ea_ref[...]                                    # [TB, E]
    eb = eb_ref[...]                                    # [TB, E]
    dt = jnp.abs(ta_ref[...] - tb_ref[...])             # [TB, 1]

    # First Linear on the (virtual) concat input, decomposed by segment.
    h = jnp.dot(ea, w1a_ref[...], preferred_element_type=jnp.float32)   # MXU
    h = h + jnp.dot(eb, w1b_ref[...], preferred_element_type=jnp.float32)
    h = h + dt * w1t_ref[...]                           # rank-1 term on VPU
    h = h + b1_ref[...]
    h = jax.nn.sigmoid(h)                               # EUP, [TB, 128] lane-dense

    # Second Linear (64 -> 1): VPU multiply + cross-lane reduce (XLU);
    # padded hidden lanes carry zero w2 so they contribute nothing.
    out = jnp.sum(h * w2_ref[...], axis=-1, keepdims=True) + b2_ref[...]  # [TB, 1]
    o_ref[...] = jax.nn.sigmoid(out).astype(o_ref.dtype)


# ----------------------------------------------------------------------------
# Module wrapper
# ----------------------------------------------------------------------------
class EmbeddingComparisonModel:
    def __init__(self, embed_len, key=jax.random.PRNGKey(42)):
        self.embed_len = embed_len
        in_dim = 2 * embed_len + 1
        k1, k2, k3, k4 = jax.random.split(key, 4)

        # PyTorch-style uniform(-1/sqrt(fan_in), 1/sqrt(fan_in)) init.
        lim1 = 1.0 / float(in_dim) ** 0.5
        lim2 = 1.0 / float(_HID) ** 0.5
        w1 = jax.random.uniform(k1, (in_dim, _HID), jnp.float32, -lim1, lim1)
        b1 = jax.random.uniform(k2, (_HID,), jnp.float32, -lim1, lim1)
        w2 = jax.random.uniform(k3, (_HID, 1), jnp.float32, -lim2, lim2)
        b2 = jax.random.uniform(k4, (1,), jnp.float32, -lim2, lim2)

        E = embed_len
        pad_h = _HID_PAD - _HID
        # Split W1 along the concat segments; zero-pad hidden dim to 128 lanes.
        self.w1a = jnp.pad(w1[:E], ((0, 0), (0, pad_h)))            # [E, 128]
        self.w1t = jnp.pad(w1[E:E + 1], ((0, 0), (0, pad_h)))       # [1, 128]
        self.w1b = jnp.pad(w1[E + 1:], ((0, 0), (0, pad_h)))        # [E, 128]
        self.b1 = jnp.pad(b1[None, :], ((0, 0), (0, pad_h)))        # [1, 128]
        self.w2 = jnp.pad(w2.T, ((0, 0), (0, pad_h)))               # [1, 128]
        self.b2 = b2[None, :]                                       # [1, 1]

    def __call__(self, embed_A, time_A, embed_B, time_B):
        return self.forward(embed_A, time_A, embed_B, time_B)

    def forward(self, embed_A, time_A, embed_B, time_B):
        E = self.embed_len

        def _2d(a):
            a = jnp.asarray(a, jnp.float32)
            return a[:, None] if a.ndim == 1 else a

        ea, ta, eb, tb = map(_2d, (embed_A, time_A, embed_B, time_B))
        B = ea.shape[0]

        # Pad batch to a sublane-aligned multiple of the batch tile.
        Bp = ((B + _BATCH_TILE - 1) // _BATCH_TILE) * _BATCH_TILE
        if Bp != B:
            pad = ((0, Bp - B), (0, 0))
            ea, ta, eb, tb = (jnp.pad(a, pad) for a in (ea, ta, eb, tb))

        grid = (Bp // _BATCH_TILE,)

        def batch_spec(d):
            return pl.BlockSpec((_BATCH_TILE, d), lambda i: (i, 0))

        def const_spec(shape):
            return pl.BlockSpec(shape, lambda i: (0, 0))

        out = pl.pallas_call(
            _embed_cmp_kernel,
            grid=grid,
            in_specs=[
                batch_spec(E),              # embed_A tile
                batch_spec(1),              # time_A tile
                batch_spec(E),              # embed_B tile
                batch_spec(1),              # time_B tile
                const_spec((E, _HID_PAD)),  # W1a
                const_spec((1, _HID_PAD)),  # w1_t
                const_spec((E, _HID_PAD)),  # W1b
                const_spec((1, _HID_PAD)),  # b1
                const_spec((1, _HID_PAD)),  # w2 (row)
                const_spec((1, 1)),         # b2
            ],
            out_specs=batch_spec(1),
            out_shape=jax.ShapeDtypeStruct((Bp, 1), jnp.float32),
            compiler_params=pltpu.CompilerParams(
                dimension_semantics=("parallel",)),   # lets v7x use both TCs
        )(ea, ta, eb, tb,
          self.w1a, self.w1t, self.w1b, self.b1, self.w2, self.b2)

        return out[:B]


if __name__ == "__main__":
    key = jax.random.PRNGKey(0)
    embed_len = 32
    batch = 16
    k1, k2, k3, k4 = jax.random.split(key, 4)
    embed_A = jax.random.normal(k1, (batch, embed_len), jnp.float32)
    embed_B = jax.random.normal(k2, (batch, embed_len), jnp.float32)
    time_A = jax.random.uniform(k3, (batch, 1), jnp.float32, 0.0, 10.0)
    time_B = jax.random.uniform(k4, (batch, 1), jnp.float32, 0.0, 10.0)

    model = EmbeddingComparisonModel(embed_len)
    out = model(embed_A, time_A, embed_B, time_B)
    out = jax.block_until_ready(out)
    assert out.shape == (batch, 1) and out.dtype == jnp.float32

    # Pure-JAX reference of the original PyTorch forward.
    w1_full = jnp.concatenate(
        [model.w1a[:, :_HID], model.w1t[:, :_HID], model.w1b[:, :_HID]], axis=0)
    b1_full = model.b1[0, :_HID]
    w2_full = model.w2[0, :_HID]
    b2_full = model.b2[0, 0]
    x = jnp.concatenate([embed_A, jnp.abs(time_A - time_B), embed_B], axis=1)
    h_ref = jax.nn.sigmoid(x @ w1_full + b1_full)
    out_ref = jax.nn.sigmoid(h_ref @ w2_full[:, None] + b2_full)

    assert bool(jnp.all(jnp.isfinite(out)))
    assert bool(jnp.allclose(out, out_ref, atol=1e-5, rtol=1e-5))
    print("KERNEL_OK")
</pallas_src>

<mosaic_0001>
module attributes {stable_mosaic.version = 11 : i64} {
  func.func @_embed_cmp_kernel(%arg0: i32, %arg1: memref<8x32xf32, #tpu.memory_space<vmem>>, %arg2: memref<8x1xf32, #tpu.memory_space<vmem>>, %arg3: memref<8x32xf32, #tpu.memory_space<vmem>>, %arg4: memref<8x1xf32, #tpu.memory_space<vmem>>, %arg5: memref<32x128xf32, #tpu.memory_space<vmem>>, %arg6: memref<1x128xf32, #tpu.memory_space<vmem>>, %arg7: memref<32x128xf32, #tpu.memory_space<vmem>>, %arg8: memref<1x128xf32, #tpu.memory_space<vmem>>, %arg9: memref<1x128xf32, #tpu.memory_space<vmem>>, %arg10: memref<1x1xf32, #tpu.memory_space<vmem>>, %arg11: memref<8x1xf32, #tpu.memory_space<vmem>>) attributes {dimension_semantics = [#tpu.dimension_semantics<parallel>], iteration_bounds = array<i64: 2>, scalar_prefetch = 0 : i64, scratch_operands = 0 : i64, tpu.core_type = #tpu.core_type<tc>, window_params = [{transform_indices = @transform_0, window_bounds = array<i64: 8, 32>}, {transform_indices = @transform_1, window_bounds = array<i64: 8, 1>}, {transform_indices = @transform_2, window_bounds = array<i64: 8, 32>}, {transform_indices = @transform_3, window_bounds = array<i64: 8, 1>}, {pipeline_mode = #tpu.pipeline_mode<synchronous>, transform_indices = @transform_4, window_bounds = array<i64: 32, 128>}, {pipeline_mode = #tpu.pipeline_mode<synchronous>, transform_indices = @transform_5, window_bounds = array<i64: 1, 128>}, {pipeline_mode = #tpu.pipeline_mode<synchronous>, transform_indices = @transform_6, window_bounds = array<i64: 32, 128>}, {pipeline_mode = #tpu.pipeline_mode<synchronous>, transform_indices = @transform_7, window_bounds = array<i64: 1, 128>}, {pipeline_mode = #tpu.pipeline_mode<synchronous>, transform_indices = @transform_8, window_bounds = array<i64: 1, 128>}, {pipeline_mode = #tpu.pipeline_mode<synchronous>, transform_indices = @transform_9, window_bounds = array<i64: 1, 1>}, {transform_indices = @transform_10, window_bounds = array<i64: 8, 1>}]} {
    %c0 = arith.constant 0 : index
    %c0_0 = arith.constant 0 : index
    %0 = vector.load %arg1[%c0, %c0_0] : memref<8x32xf32, #tpu.memory_space<vmem>>, vector<8x32xf32>
    %c0_1 = arith.constant 0 : index
    %c0_2 = arith.constant 0 : index
    %1 = vector.load %arg3[%c0_1, %c0_2] : memref<8x32xf32, #tpu.memory_space<vmem>>, vector<8x32xf32>
    %c0_3 = arith.constant 0 : index
    %c0_4 = arith.constant 0 : index
    %2 = vector.load %arg2[%c0_3, %c0_4] : memref<8x1xf32, #tpu.memory_space<vmem>>, vector<8x1xf32>
    %c0_5 = arith.constant 0 : index
    %c0_6 = arith.constant 0 : index
    %3 = vector.load %arg4[%c0_5, %c0_6] : memref<8x1xf32, #tpu.memory_space<vmem>>, vector<8x1xf32>
    %4 = arith.subf %2, %3 : vector<8x1xf32>
    %5 = math.absf %4 : vector<8x1xf32>
    %c0_7 = arith.constant 0 : index
    %c0_8 = arith.constant 0 : index
    %6 = vector.load %arg5[%c0_7, %c0_8] : memref<32x128xf32, #tpu.memory_space<vmem>>, vector<32x128xf32>
    %cst = arith.constant dense<0.000000e+00> : vector<8x128xf32>
    %7 = tpu.matmul %0, %6, %cst {dimension_numbers = #tpu.dot_dimension_numbers<[1], [0], [0], [1], [0, 0, 1, 1], [], []>} : vector<8x32xf32>, vector<32x128xf32>, vector<8x128xf32> -> vector<8x128xf32>
    %c0_9 = arith.constant 0 : index
    %c0_10 = arith.constant 0 : index
    %8 = vector.load %arg7[%c0_9, %c0_10] : memref<32x128xf32, #tpu.memory_space<vmem>>, vector<32x128xf32>
    %cst_11 = arith.constant dense<0.000000e+00> : vector<8x128xf32>
    %9 = tpu.matmul %1, %8, %cst_11 {dimension_numbers = #tpu.dot_dimension_numbers<[1], [0], [0], [1], [0, 0, 1, 1], [], []>} : vector<8x32xf32>, vector<32x128xf32>, vector<8x128xf32> -> vector<8x128xf32>
    %10 = arith.addf %7, %9 : vector<8x128xf32>
    %c0_12 = arith.constant 0 : index
    %c0_13 = arith.constant 0 : index
    %11 = vector.load %arg6[%c0_12, %c0_13] : memref<1x128xf32, #tpu.memory_space<vmem>>, vector<1x128xf32>
    %12 = vector.broadcast %5 : vector<8x1xf32> to vector<8x128xf32>
    %13 = vector.broadcast %11 : vector<1x128xf32> to vector<8x128xf32>
    %14 = arith.mulf %12, %13 : vector<8x128xf32>
    %15 = arith.addf %10, %14 : vector<8x128xf32>
    %c0_14 = arith.constant 0 : index
    %c0_15 = arith.constant 0 : index
    %16 = vector.load %arg8[%c0_14, %c0_15] : memref<1x128xf32, #tpu.memory_space<vmem>>, vector<1x128xf32>
    %17 = vector.broadcast %16 : vector<1x128xf32> to vector<8x128xf32>
    %18 = arith.addf %15, %17 : vector<8x128xf32>
    %19 = arith.negf %18 : vector<8x128xf32>
    %20 = math.exp %19 : vector<8x128xf32>
    %cst_16 = arith.constant 1.000000e+00 : f32
    %21 = vector.broadcast %cst_16 : f32 to vector<8x128xf32>
    %22 = arith.addf %21, %20 : vector<8x128xf32>
    %23 = arith.divf %21, %22 : vector<8x128xf32>
    %c0_17 = arith.constant 0 : index
    %c0_18 = arith.constant 0 : index
    %24 = vector.load %arg9[%c0_17, %c0_18] : memref<1x128xf32, #tpu.memory_space<vmem>>, vector<1x128xf32>
    %25 = vector.broadcast %24 : vector<1x128xf32> to vector<8x128xf32>
    %26 = arith.mulf %23, %25 : vector<8x128xf32>
    %cst_19 = arith.constant dense<0.000000e+00> : vector<8xf32>
    %27 = vector.multi_reduction <add>, %26, %cst_19 [1] : vector<8x128xf32> to vector<8xf32>
    %28 = vector.shape_cast %27 : vector<8xf32> to vector<8x1xf32>
    %c0_20 = arith.constant 0 : index
    %c0_21 = arith.constant 0 : index
    %29 = vector.load %arg10[%c0_20, %c0_21] : memref<1x1xf32, #tpu.memory_space<vmem>>, vector<1x1xf32>
    %30 = vector.broadcast %29 : vector<1x1xf32> to vector<8x1xf32>
    %31 = arith.addf %28, %30 : vector<8x1xf32>
    %32 = arith.negf %31 : vector<8x1xf32>
    %33 = math.exp %32 : vector<8x1xf32>
    %cst_22 = arith.constant 1.000000e+00 : f32
    %34 = vector.broadcast %cst_22 : f32 to vector<8x1xf32>
    %35 = arith.addf %34, %33 : vector<8x1xf32>
    %36 = arith.divf %34, %35 : vector<8x1xf32>
    %c0_23 = arith.constant 0 : index
    %c0_24 = arith.constant 0 : index
    %37 = vector.load %arg11[%c0_23, %c0_24] : memref<8x1xf32, #tpu.memory_space<vmem>>, vector<8x1xf32>
    tpu.vector_store %arg11[%c0_23, %c0_24], %36 {strides = array<i32>} : memref<8x1xf32, #tpu.memory_space<vmem>>, vector<8x1xf32>,
    return
  }
  func.func @transform_0(%arg0: i32) -> (i32, i32) {
    %c0_i32 = arith.constant 0 : i32
    %c0_i32_0 = arith.constant 0 : i32
    return %arg0, %c0_i32 : i32, i32
  }
  func.func @transform_1(%arg0: i32) -> (i32, i32) {
    %c0_i32 = arith.constant 0 : i32
    %c0_i32_0 = arith.constant 0 : i32
    return %arg0, %c0_i32 : i32, i32
  }
  func.func @transform_2(%arg0: i32) -> (i32, i32) {
    %c0_i32 = arith.constant 0 : i32
    %c0_i32_0 = arith.constant 0 : i32
    return %arg0, %c0_i32 : i32, i32
  }
  func.func @transform_3(%arg0: i32) -> (i32, i32) {
    %c0_i32 = arith.constant 0 : i32
    %c0_i32_0 = arith.constant 0 : i32
    return %arg0, %c0_i32 : i32, i32
  }
  func.func @transform_4(%arg0: i32) -> (i32, i32) {
    %c0_i32 = arith.constant 0 : i32
    %c0_i32_0 = arith.constant 0 : i32
    %c0_i32_1 = arith.constant 0 : i32
    return %c0_i32, %c0_i32_0 : i32, i32
  }
  func.func @transform_5(%arg0: i32) -> (i32, i32) {
    %c0_i32 = arith.constant 0 : i32
    %c0_i32_0 = arith.constant 0 : i32
    %c0_i32_1 = arith.constant 0 : i32
    return %c0_i32, %c0_i32_0 : i32, i32
  }
  func.func @transform_6(%arg0: i32) -> (i32, i32) {
    %c0_i32 = arith.constant 0 : i32
    %c0_i32_0 = arith.constant 0 : i32
    %c0_i32_1 = arith.constant 0 : i32
    return %c0_i32, %c0_i32_0 : i32, i32
  }
  func.func @transform_7(%arg0: i32) -> (i32, i32) {
    %c0_i32 = arith.constant 0 : i32
    %c0_i32_0 = arith.constant 0 : i32
    %c0_i32_1 = arith.constant 0 : i32
    return %c0_i32, %c0_i32_0 : i32, i32
  }
  func.func @transform_8(%arg0: i32) -> (i32, i32) {
    %c0_i32 = arith.constant 0 : i32
    %c0_i32_0 = arith.constant 0 : i32
    %c0_i32_1 = arith.constant 0 : i32
    return %c0_i32, %c0_i32_0 : i32, i32
  }
  func.func @transform_9(%arg0: i32) -> (i32, i32) {
    %c0_i32 = arith.constant 0 : i32
    %c0_i32_0 = arith.constant 0 : i32
    %c0_i32_1 = arith.constant 0 : i32
    return %c0_i32, %c0_i32_0 : i32, i32
  }
  func.func @transform_10(%arg0: i32) -> (i32, i32) {
    %c0_i32 = arith.constant 0 : i32
    %c0_i32_0 = arith.constant 0 : i32
    return %arg0, %c0_i32 : i32, i32
  }
}

</mosaic_0001>

<bundles_post_ra>
// kernel: tpu_custom_call.1
= control target key start
LH: loop header
LB: loop body
LE: loop exit
PB: predicated region body
PF: predicated region fallthrough
CT: control target
= control target key end

     0   :  { %s1245_s0 = inlined_call_operand.vmem [shape: f32[16,32], index: 0, kind: input, shape index: {}]   ;;  %s1246_s1 = inlined_call_operand.vmem [shape: f32[16,1], index: 1, kind: input, shape index: {}]   ;;  %s1247_s2 = inlined_call_operand.hbm [shape: f32[16,32], index: 2, kind: input, shape index: {}]   ;;  %s1248_s3 = inlined_call_operand.vmem [shape: f32[16,1], index: 3, kind: input, shape index: {}]   ;;  %s1249_s4 = inlined_call_operand.vmem [shape: f32[32,128], index: 4, kind: input, shape index: {}]   ;;  %s1250_s5 = inlined_call_operand.vmem [shape: f32[1,128], index: 5, kind: input, shape index: {}]   ;;  %s1251_s6 = inlined_call_operand.hbm [shape: f32[32,128], index: 6, kind: input, shape index: {}]   ;;  %s1252_s7 = inlined_call_operand.vmem [shape: f32[1,128], index: 7, kind: input, shape index: {}]   ;;  %s1253_s8 = inlined_call_operand.vmem [shape: f32[1,128], index: 8, kind: input, shape index: {}]   ;;  %s1254_s9 = inlined_call_operand.<no memory space> [shape: f32[1,1], index: 9, kind: input, shape index: {}]   ;;  %s1255_s10 = inlined_call_operand.vmem [shape: f32[16,1], index: 10, kind: output, shape index: {}]  }
   0x1   :  { %v15_v0 = vstv %s1254_s9 }
   0x2   :  { %16 = vst [vmem:[#allocation2] sm:$0x1] %v15_v0 }
   0x3   :  { %17 = vsyncpa [#allocation4], 0 }
   0x4   :  { %19 = vsyncpa [#allocation4 + $0x1], 0 }
   0x5   :  { %20 = vsyncpa [#allocation6], 0  ;;  %s1065_s15 = smov 0   ;;  %s1067_s16 = smov 0  }
   0x6   :  { %s1069_s17 = smov 0   ;;  %s1071_s18 = smov 0  }
   0x7 LB: > { %s1084_s9 = sadd.s32 4294967295, %s997_s18   ;;  %p98_p0 = scmp.ne.s32.totalorder %s989_s16, %s985_s15  ;;  %s997_s18 = sphi %s1071_s18, %s1270_s18   ;;  %s993_s17 = sphi %s1069_s17, %s1273_s17   ;;  %s989_s16 = sphi %s1067_s16, %s1272_s16   ;;  %s985_s15 = sphi %s1065_s15, %s1271_s15  }
   0x8   : > { %p1256_p1 = scmp.eq.s32.totalorder %s1084_s9, 0  ;;  %p770_p2 = scmp.ge.s32.totalorder %s997_s18, 1 }
   0x9   : > { %p287_p3 = scmp.lt.s32.totalorder %s997_s18, 3  ;;  %s999_s21 = smov [#allocation5]  }
   0xa   : > { %p1092_p4 = por %p1256_p1, %p98_p0  ;;  %s305_s22 = sshll.u32 %s999_s21, 4  ;;  %s306_s22 = int_to_ptr.vmem [resolvable:$true] %s305_s22 }
   0xb   : > { %p1096_p5 = pnand %p770_p2, %p287_p3  ;;  %s1109_s24 = sadd.s32 1, %s997_s18  }
   0xc   : > { %s1261_s19 = scalar_select %p1092_p4, 1, 0 }
   0xd   : > { %s1262_s20 = scalar_select %p1096_p5, 1, 0 }
   0xe   : > { %p842_p6 = pneg %p1096_p5  ;;  %1264 = sst [smem:[#allocation9_spill]] %s1109_s24 }
   0xf   : > { %s85_s25 = sadd.s32 1, %s993_s17  ;;  %s82_s26 = ssub.s32 %s997_s18, %s1109_s24 }
  0x10   : > { %p1104_p7 = pnand %p842_p6, %p1256_p1  ;;  %s901_s29 = scalar_lea.hbm %s1251_s6, 512 }
  0x11   : > { %p902_p8 = scmp.ne.s32.totalorder %s1251_s6, %s901_s29  ;;  %p908_p12 = scmp.lt.u32.totalorder %s901_s29, %s1251_s6 }
  0x12   : > { %p903_p9 = pneg %p1104_p7 }
  0x14   : > { %p904_p10 = pnand %p903_p9, %p902_p8 }
  0x16   : > { %p905_p11 = pneg %p904_p10 }
  0x18   : > { %p910_p13 = pnand %p908_p12, %p905_p11 }
  0x1a   : > { %913 = shalt.err (!%p910_p13)
}
  0x1b   : > { %s914_s14 = scalar_lea.vmem %s306_s22, 512  ;;  %p922_p6 = scmp.lt.s32.totalorder %s306_s22, %s306_s22 }
  0x1c   : > { %p915_p0 = scmp.ne.s32.totalorder %s306_s22, %s914_s14  ;;  %p923_p1 = scmp.lt.s32.totalorder %s914_s14, %s914_s14 }
  0x1e   : > { %p917_p2 = pnand %p915_p0, %p903_p9  ;;  %p924_p4 = por %p923_p1, %p922_p6 }
  0x20   : > { %p918_p3 = pneg %p917_p2 }
  0x22   : > { %p925_p5 = pnand %p924_p4, %p918_p3 }
  0x24   : > { %928 = shalt.err (!%p925_p5)
}
  0x25   : > { %s1000_s15 = smov 128   ;;  %s1001_s21 = smov 8  }
  0x26   : > { %845 = dma.hbm_to_vmem [thread:$0]  (!%p1104_p7), %s1251_s6, 512, %s306_s22, [#allocation6], %s1000_s15, %s1000_s15, %s1001_s21  }
  0x27   : > { %p83_p8 = scmp.eq.s32.totalorder %s82_s26, 0  ;;  %p92_p9 = scmp.ne.s32.totalorder %s993_s17, %s989_s16 }
  0x28   : > { %p93_p1 = scmp.eq.s32.totalorder %s997_s18, 0  ;;  %p851_p4 = scmp.lt.s32.totalorder %s997_s18, 2 }
  0x29   : > { %s1135_s29 = scalar_select %p83_p8, %s993_s17, %s85_s25  }
  0x2a   : > { %p94_p5 = por %p93_p1, %p92_p9  ;;  %s342_s30 = sand.u32 1, %s993_s17  }
  0x2b   : > { %s773_s11 = sshll.u32 %s342_s30, 3  ;;  %s774_s12 = sshll.u32 %s997_s18, 7 }
  0x2c   : > { %s1142_s24 = scalar_lea.hbm %s1247_s2, %s774_s12  ;;  %s346_s22 = scalar_lea.vmem [#allocation3], %s773_s11 }
  0x2d   : > { %s353_s23 = sshll.u32 %s346_s22, 4  ;;  %p1146_p7 = pnand %p851_p4, %p94_p5  ;;  %s1144_s23 = int_to_ptr.vmem [resolvable:$true] %s353_s23 }
  0x2e   : > { %s343_s18 = scalar_lea.sflag [#allocation4], %s342_s30  ;;  %s929_s26 = scalar_lea.hbm %s1142_s24, 128 }
  0x2f   : > { %p930_p10 = scmp.ne.s32.totalorder %s1142_s24, %s929_s26  ;;  %p931_p11 = pneg %p1146_p7 }
  0x30   : > { %s934_s27 = scalar_lea.hbm %s1247_s2, 256  ;;  %p935_p0 = scmp.lt.u32.totalorder %s1142_s24, %s1247_s2 }
  0x31   : > { %p932_p12 = pnand %p931_p11, %p930_p10  ;;  %p936_p2 = scmp.lt.u32.totalorder %s934_s27, %s929_s26 }
  0x32   : > { %p938_p6 = scmp.lt.u32.totalorder %s929_s26, %s1142_s24 }
  0x33   : > { %p933_p13 = pneg %p932_p12  ;;  %p937_p3 = por %p936_p2, %p935_p0 }
  0x35   : > { %p939_p8 = por %p938_p6, %p937_p3 }
  0x37   : > { %p940_p9 = pnand %p939_p8, %p933_p13 }
  0x39   : > { %943 = shalt.err (!%p940_p9)
}
  0x3a   : > { %s944_s30 = scalar_lea.vmem %s1144_s23, 128  ;;  %s1002_s12 = smov [#allocation3]  }
  0x3b   : > { %p945_p1 = scmp.ne.s32.totalorder %s1144_s23, %s944_s30  ;;  %s949_s13 = sshll.u32 %s1002_s12, 4  ;;  %s950_s13 = int_to_ptr.vmem [resolvable:$false] %s949_s13 }
  0x3c   : > { %s951_s14 = scalar_lea.vmem %s950_s13, 256  ;;  %p952_p10 = scmp.lt.s32.totalorder %s1144_s23, %s950_s13 }
  0x3d   : > { %p947_p4 = pnand %p945_p1, %p931_p11  ;;  %p953_p12 = scmp.lt.s32.totalorder %s951_s14, %s944_s30 }
  0x3f   : > { %p948_p5 = pneg %p947_p4  ;;  %p954_p0 = por %p953_p12, %p952_p10 }
  0x41   : > { %p955_p2 = pnand %p954_p0, %p948_p5 }
  0x43   : > { %958 = shalt.err (!%p955_p2)
}
  0x44   : > { %849 = dma.hbm_to_vmem [thread:$0]  (!%p1146_p7), %s1142_s24, 128, %s1144_s23, %s343_s18  }
  0x45   : > { %p1266_p13 = scmp.ne.s32.totalorder %s1262_s20, 0 }
  0x46   : > { %s371_s22 = sand.u32 (!%p1266_p13), 1, %s989_s16   ;;  %p1267_p11 = scmp.ne.s32.totalorder (!%p1266_p13), %s1261_s19, 0 }
  0x47   : > { %369 = sbr.rel (%p1266_p13) target bundleno = 511 (0x1ff), region = 60  ;;  %s1178_s26 = sshll.u32 (!%p1266_p13), %s371_s22, 3 }
  0x48   : > { %s372_s15 = scalar_lea.sflag (!%p1266_p13), [#allocation4], %s371_s22  ;;  %s375_s21 = scalar_lea.vmem (!%p1266_p13), [#allocation3], %s1178_s26 }
  0x4e   : > { %976 = dma.done.wait (%p1267_p11), %s372_s15, 128  }
  0x4f   : > { %978 = vsyncadd (%p1267_p11), %s372_s15, 4294967168  ;;  %p1268_p3 = scmp.eq.s32.totalorder %s1084_s9, 0 }
  0x51   : > { %980 = dma.done.wait (%p1268_p3), [#allocation6], 512   ;;  %p1269_p7 = pmov %p1268_p3 }
  0x52   : > { %v1003_v1 = vmov 0.0|0.0   ;;  %p427_p6 = scmp.lt.s32.totalorder %s1084_s9, 1  ;;  %vm1004_vm0 = vmmov 0   ;;  %v1005_v2 = vmov 0.0   ;;  %v1006_v3 = vmov 0   ;;  %v453_v4 = vld [vmem:[#allocation5] sm:$0xff] }
  0x53   : > { %982 = vsyncadd (%p1269_p7), [#allocation6], 4294966784  ;;  %824 = vmatprep.subr.bf16.mxu0 %v1003_v1  ;;  %830 = vmatprep.subr.bf16.mxu1 %v1003_v1  ;;  %v454_v5 = vld [vmem:[#allocation5 + $0x8] sm:$0xff]  ;;  %v450_v8 = vld [vmem:[%s1249_s4 + $0x8] sm:$0xff]  ;;  %vm457_vm1 = vcmask 261120   ;;  %vm656_vm2 = vcmask 7168  }
  0x54   : > { %810 = vmatprep.mubr.msk.f32.mxu0 %vm1004_vm0, %v1005_v2  ;;  %821 = vmatprep.mubr.msk.f32.mxu1 %vm1004_vm0, %v1005_v2  ;;  %s1275_s9 = smov (!%p427_p6, %s1084_s9), 1  ;;  %v449_v6 = vld [vmem:[%s1249_s4] sm:$0xff]  ;;  %v825_v7 = vpack.c.bf16 %v454_v5, %v453_v4  ;;  %v456_v10 = vld [vmem:[#allocation5 + $0x18] sm:$0xff]  ;;  %v452_v13 = vld [vmem:[%s1249_s4 + $0x18] sm:$0xff] }
  0x55   : > { %892 = vset.pattern.permute.xlu0 %v1006_v3  ;;  %s1191_s19 = sshll.u32 %s1275_s9, 3  ;;  %v455_v9 = vld [vmem:[#allocation5 + $0x10] sm:$0xff]  ;;  %v831_v11 = vpack.c.bf16 %v450_v8, %v449_v6  ;;  %v451_v12 = vld [vmem:[%s1249_s4 + $0x10] sm:$0xff]  ;;  %v784_v22 = vld [vmem:[%s1250_s5] ss:$0 sm:$0xff] }
  0x56   : > { %s434_s18 = scalar_lea.vmem %s1246_s1, %s1191_s19  ;;  %s438_s11 = scalar_lea.vmem %s1248_s3, %s1191_s19  ;;  %826 = vmatpush3.bf16.msra.mxu0 %v825_v7  ;;  %v828_v14 = vpack.c.bf16 %v456_v10, %v455_v9  ;;  %v834_v17 = vpack.c.bf16 %v452_v13, %v451_v12  ;;  %v444_v20 = vld [vmem:[%s375_s21] sm:$0xff]  ;;  %v785_v30 = vld [vmem:[%s1252_s7] ss:$0 sm:$0xff] }
  0x57   : > { %v445_v15 = vld [vmem:[%s434_s18] sm:$0xff]  ;;  %832 = vmatpush3.bf16.msra.mxu1 %v831_v11  ;;  %827 = vmatprep.subr.bf16.mxu0 %v1003_v1  ;;  %s430_s24 = scalar_lea.vmem %s1245_s0, %s1191_s19  ;;  %s442_s30 = scalar_lea.vmem %s1255_s10, %s1191_s19 }
  0x58   : > { %v446_v16 = vld [vmem:[%s438_s11] sm:$0xff]  ;;  %833 = vmatprep.subr.bf16.mxu1 %v1003_v1 }
  0x59   : > { %v447_v18 = vsub.f32 %v445_v15, %v446_v16  ;;  %v443_v21 = vld [vmem:[%s430_s24] sm:$0xff] }
  0x5a   : > { %829 = vmatpush3.bf16.msra.mxu0 %v828_v14  ;;  %v787_v36 = vld [vmem:[%s1253_s8] ss:$0 sm:$0xff] }
  0x5b   : > { %v448_v19 = vand.u32 2147483647, %v447_v18  ;;  %835 = vmatpush3.bf16.msra.mxu1 %v834_v17  ;;  %v788_v39 = vld [vmem:[#allocation2] ss:$0 sm:$0xff] }
  0x5d   : > { %607 = vperm.xlu0 %892, %v448_v19   ;;  %811 = vmatmul.mubr.msk.f32.vlgmr.msra.gmra.mrb[0].mxu0 %vm457_vm1, %v444_v20 }
  0x5e   : > { %822 = vmatmul.mubr.msk.f32.vlgmr.msra.gmra.mrb[0].mxu1 %vm457_vm1, %v443_v21 }
  0xdc   : > { %v608_v23 = vpop.permute.xlu0 %607 }
  0xdd   : > { %v616_v24 = vmul.f32 %v784_v22, %v608_v23 }
 0x130   : > { %v527_v25 = vpop.f32.mrb[0].mxu0 }
 0x131   : > { %v600_v26 = vpop.f32.mrb[0].mxu1  ;;  %v812_v27 = vpop.f32.mrb[1].mxu0 }
 0x132   : > { %v601_v28 = vadd.f32 %v600_v26, %v527_v25  ;;  %v823_v29 = vpop.f32.mrb[1].mxu1 }
 0x134   : > { %v617_v31 = vadd.f32 %v616_v24, %v601_v28 }
 0x136   : > { %v625_v32 = vadd.f32 %v785_v30, %v617_v31 }
 0x138   : > { %v786_v33 = vmul.f32 -1.442695, %v625_v32 }
 0x13a   : > { %893 = vpow2.f32 %v786_v33 }
 0x144   : > { %v894_v34 = vpop.eup %893 }
 0x145   : > { %v629_v35 = vadd.f32 1.0, %v894_v34 }
 0x147   : > { %895 = vrcp.f32 %v629_v35 }
 0x151   : > { %v896_v37 = vpop.eup %895 }
 0x152   : > { %v639_v38 = vmul.f32 %v896_v37, %v787_v36 }
 0x154   : > { %640 = vadd.xlane.f32.xlu0 %v639_v38 }
 0x1e1   : > { %v641_v40 = vpop.xlane.xlu0 %640 }
 0x1e2   : > { %v649_v41 = vadd.f32 %v788_v39, %v641_v40 }
 0x1e4   : > { %v789_v42 = vmul.f32 -1.442695, %v649_v41 }
 0x1e6   : > { %897 = vpow2.f32 %v789_v42 }
 0x1f0   : > { %v898_v43 = vpop.eup %897 }
 0x1f1   : > { %v653_v44 = vadd.f32 1.0, %v898_v43 }
 0x1f3   : > { %899 = vrcp.f32 %v653_v44 }
 0x1fd   : > { %v900_v45 = vpop.eup %899 }
 0x1fe   : > { %657 = vst.msk [vmem:[%s442_s30] sm:$0xff] %vm656_vm2, %v900_v45 }
 0x1ff PF: > { %s1270_s18 = sld [smem:[#allocation9_spill]]  ;;  %s1271_s15 = smov %s989_s16 }
 0x200   : > { %s1272_s16 = smov %s993_s17  ;;  %s1273_s17 = smov %s1135_s29 }
 0x205   : > { %p23_p8 = scmp.ge.s32.totalorder %s1270_s18, 4  }
 0x207   :  { %25 = sbr.rel (!%p23_p8) target bundleno = 7 (0x7), region = 113 }
 0x20e   :  { %677 = vsyncpa [#allocation4], 1 }
 0x20f   :  { %679 = vsyncpa [#allocation4 + $0x1], 1 }
 0x210   :  { %680 = vsyncpa [#allocation6], 1 }

</bundles_post_ra>
